<compile_context>
chip_gen: v5e
topology: v5e:2x2
jax: 0.10.0
libtpu: 0.0.40
codegen_flags: <defaults>
</compile_context>

<pallas_src>
import functools
import numpy as np

import jax
import jax.numpy as jnp
from jax import lax
from jax.experimental import pallas as pl
from jax.experimental.pallas import tpu as pltpu


_KRON_MAX_ELEMS_F32 = 512        # kron path if H*W below this (f32 matrices)
_KRON_MAX_ELEMS_BF16 = 1024      # ... or this (bf16 matrices)
_KRON_MAX_WASTE = 8              # ... or dense MACs <= 8x the needed k1*k2
_KRON_MAX_BYTES = 4 << 20        # kron matrix must stay comfortably in VMEM
_KRON_PLANE_CAP = 4096           # max planes per grid step (kron path)
_SEP_PLANE_CAP = 1024            # max planes per grid step (separable path)
_HEADROOM_BYTES = 4 << 20        # Mosaic internal scratch / alignment slop


def _cdiv(a, b):
    return -(-a // b)


def _round_up(v, m):
    return _cdiv(v, m) * m


def _sublane_pack(dtype):
    # rows per 32-bit sublane tile: f32 -> 8, bf16 -> 16, int8/fp8 -> 32
    return 8 * (4 // int(np.dtype(dtype).itemsize))


# ----------------------------------------------------------------------------
# Generation-aware VMEM budgets
# ----------------------------------------------------------------------------
def _vmem_info():
    """Returns (per-core VMEM capacity bytes, is_two_tensorcore_chip)."""
    cap = None
    get_info = getattr(pltpu, "get_tpu_info", None)
    if get_info is not None:
        try:
            cap = int(getattr(get_info(), "vmem_capacity_bytes", 0)) or None
        except Exception:
            cap = None
    kind = ""
    try:
        kind = jax.devices()[0].device_kind.lower()
    except Exception:
        pass
    is_v7 = ("v7" in kind) or ("7x" in kind)
    if cap is None:
        # Conservative default unless we positively identify a 128 MiB chip.
        cap = (128 << 20) if (("v5" in kind) or ("v6" in kind)) else (64 << 20)
    if is_v7:
        cap = min(cap, 64 << 20)          # 64 MiB per TensorCore on v7x
    multi_tc = is_v7 or cap < (100 << 20)
    return cap, multi_tc


def _budgets():
    cap, multi_tc = _vmem_info()
    if cap >= (100 << 20):                # v5e / v6e: 128 MiB VMEM, single TC
        block_budget = 48 << 20
        vmem_cap = min(int(0.78 * cap), 100 << 20)
    else:                                 # v7x (64 MiB / TC) or smaller
        block_budget = max(8 << 20, int(0.28 * cap))
        vmem_cap = int(0.75 * cap)
    return block_budget, vmem_cap, multi_tc


# ----------------------------------------------------------------------------
# Block-size selection (VMEM-aware, megacore-aware)
# ----------------------------------------------------------------------------
def _choose_batch(nc, bytes_per_plane, resident_bytes, *, cap, align, budget,
                  multi_tc, require_align):
    """Pick planes-per-grid-step b (and step count).

    bytes_per_plane already includes pipelining factors (double-buffered
    input+output blocks plus any per-plane scratch)."""
    usable = max(1 << 20, budget - resident_bytes)
    b = int(max(1, usable // max(1, bytes_per_plane)))
    b = int(min(b, cap, nc))
    if multi_tc and nc >= 2 * align:
        b = min(b, _cdiv(nc, 2))          # keep >= 2 steps: both v7x TCs busy
    if b < nc:
        if b >= align:
            b = (b // align) * align      # sublane-aligned leading block dim
        elif require_align:
            b = min(nc, align)            # 2-D blocks need 8-row alignment
        # Prefer a batch that divides nc (no ragged final block) when we give
        # up at most ~half the block size.
        step = align if b >= align else 1
        for cand in range(b, max(step, b // 2) - 1, -step):
            if nc % cand == 0:
                b = cand
                break
    steps = _cdiv(nc, b)
    if multi_tc and steps > 1 and steps % 2:
        # best-effort even step count for the 2-TensorCore chip
        cand = _cdiv(nc, steps + 1)
        if cand >= align:
            cand = _round_up(cand, align)
        elif require_align:
            cand = align
        cand = int(min(max(cand, 1), cap, nc))
        if _cdiv(nc, cand) % 2 == 0:
            b, steps = cand, _cdiv(nc, cand)
    return int(b), int(steps)


def _const_spec(shape, single_buffer):
    index_map = lambda *_: (0,) * len(shape)
    if single_buffer:
        # Constant operand: no need for a second (double) buffer.
        return pl.BlockSpec(shape, index_map, pipeline_mode=pl.Buffered(1))
    return pl.BlockSpec(shape, index_map)


# ----------------------------------------------------------------------------
# Kernels
# ----------------------------------------------------------------------------
def _pool_kernel_kron(x_ref, k_ref, o_ref, *, inv_area):
    # x_ref: (B, H*W); k_ref: (H*W, P); o_ref: (B, P)   P = round_up(OH*OW, 128)
    y = jnp.dot(x_ref[...], k_ref[...], preferred_element_type=jnp.float32)
    o_ref[...] = (y * inv_area).astype(o_ref.dtype)


def _pool_kernel_sep_flat(x_ref, ml_ref, mr_ref, o_ref, t_ref, *, inv_area, unroll):
    # x_ref: (B, H, W); ml_ref: (OHp, H) f32; mr_ref: (W, OWp); o_ref: (B, OHp, OWp)
    # t_ref: VMEM scratch (B*H, OWp) f32 -- intermediate stays f32 (no bf16 hop).
    bb, h, w = x_ref.shape
    pack = _sublane_pack(x_ref.dtype)
    # One MXU-filling right matmul over all planes (M = B*H, lane-dense N).
    t_ref[...] = jnp.dot(x_ref[...].reshape(bb * h, w), mr_ref[...],
                         preferred_element_type=jnp.float32)
    ml = ml_ref[...]

    # TODO(synk): batch these left matmuls into a single (OHp, B*OWp) matmul
    # once rank-3 leading-dim transposes are dependable in Mosaic.
    def body(bidx, carry):
        off = pl.multiple_of(bidx * h, pack)
        yb = jnp.dot(ml, t_ref[pl.ds(off, h), :],
                     preferred_element_type=jnp.float32)
        o_ref[bidx] = (yb * inv_area).astype(o_ref.dtype)
        return carry

    lax.fori_loop(0, bb, body, 0, unroll=min(unroll, bb))


def _pool_kernel_sep(x_ref, ml_ref, mr_ref, o_ref, *, inv_area, unroll):
    # Per-plane fallback when (B, H, W) -> (B*H, W) is not layout-clean.
    bb = x_ref.shape[0]
    ml = ml_ref[...]
    mr = mr_ref[...]

    def body(bidx, carry):
        t = jnp.dot(x_ref[bidx], mr, preferred_element_type=jnp.float32)
        yb = jnp.dot(ml, t, preferred_element_type=jnp.float32)
        o_ref[bidx] = (yb * inv_area).astype(o_ref.dtype)
        return carry

    lax.fori_loop(0, bb, body, 0, unroll=min(unroll, bb))


# ----------------------------------------------------------------------------
# Constant selection matrices (box-sum + optional replicate pad folded in)
# ----------------------------------------------------------------------------
def _build_mats(h, w, k1, k2, auto_pad):
    oh, ow = h - k1 + 1, w - k2 + 1
    A = np.zeros((oh, h), np.float32)            # "valid" k1-window sum (rows)
    for i in range(oh):
        A[i, i:i + k1] = 1.0
    B = np.zeros((w, ow), np.float32)            # "valid" k2-window sum (cols)
    for j in range(ow):
        B[j:j + k2, j] = 1.0
    if not auto_pad:
        return A, B
    # Replicate-pad back to (h, w) (torch F.pad mode='replicate').
    pad_t = (h - oh) // 2
    pad_l = (w - ow) // 2
    Pr = np.zeros((h, oh), np.float32)
    for i in range(h):
        Pr[i, int(np.clip(i - pad_t, 0, oh - 1))] = 1.0
    Pc = np.zeros((ow, w), np.float32)
    for j in range(w):
        Pc[int(np.clip(j - pad_l, 0, ow - 1)), j] = 1.0
    return Pr @ A, B @ Pc


# ----------------------------------------------------------------------------
# Public wrapper (matches AvgPool2d.forward, slow/exact path)
# ----------------------------------------------------------------------------
def avg_pool2d_tlc(x, kernel_size=None, base_size=None, auto_pad=True,
                   fast_imp=False, train_size=None, max_planes_per_step=None):
    n, c, h, w = x.shape
    if kernel_size is None and base_size is not None:
        if isinstance(base_size, int):
            base_size = (base_size, base_size)
        kernel_size = [h * base_size[0] // train_size[-2],
                       w * base_size[1] // train_size[-1]]
    if isinstance(kernel_size, int):
        kernel_size = (kernel_size, kernel_size)
    if kernel_size[0] >= h and kernel_size[1] >= w:
        # Reference returns adaptive_avg_pool2d(x, 1) early (no auto_pad).
        return jnp.mean(x, axis=(2, 3), keepdims=True)
    # TODO(synk): fast_imp path (strided cumsum + F.interpolate) not implemented.

    k1, k2 = min(h, kernel_size[0]), min(w, kernel_size[1])
    mat_dtype = jnp.bfloat16 if x.dtype == jnp.bfloat16 else jnp.float32
    ml_np, mr_np = _build_mats(h, w, k1, k2, auto_pad)
    oh, ow = ml_np.shape[0], mr_np.shape[1]
    inv_area = 1.0 / float(k1 * k2)

    nc = n * c
    itemsize = int(np.dtype(x.dtype).itemsize)
    mat_itemsize = int(np.dtype(mat_dtype).itemsize)
    pack = _sublane_pack(x.dtype)
    block_budget, vmem_cap, multi_tc = _budgets()

    # ---- path selection: kron (one lane-dense matmul) vs separable ----------
    kron_cols = _round_up(oh * ow, 128)            # lane-dense output minor dim
    kron_bytes = (h * w) * kron_cols * mat_itemsize
    kron_elems_limit = (_KRON_MAX_ELEMS_BF16 if mat_itemsize == 2
                        else _KRON_MAX_ELEMS_F32)
    use_kron = ((h * w <= kron_elems_limit or h * w <= _KRON_MAX_WASTE * k1 * k2)
                and kron_bytes <= _KRON_MAX_BYTES)

    if use_kron:
        # -- small planes: one MXU matmul per grid step, lane-dense output ----
        kmat_np = np.zeros((h * w, kron_cols), np.float32)
        kmat_np[:, :oh * ow] = np.kron(ml_np.T, mr_np)
        kmat = jnp.asarray(kmat_np, dtype=mat_dtype)

        cap = _KRON_PLANE_CAP if max_planes_per_step is None else int(max_planes_per_step)
        bytes_per_plane = 2 * (h * w + kron_cols) * itemsize   # dbl-buf in+out
        b, steps = _choose_batch(
            nc, bytes_per_plane, 2 * kron_bytes, cap=cap, align=pack,
            budget=block_budget, multi_tc=multi_tc, require_align=True)
        xr = x.reshape(nc, h * w)          # free reshape; no HBM pad copy (#7)
        needed = b * bytes_per_plane + 2 * kron_bytes + _HEADROOM_BYTES
        vmem_limit = int(min(max(needed, 32 << 20), vmem_cap))

        def run(single_buffer_consts):
            return pl.pallas_call(
                functools.partial(_pool_kernel_kron, inv_area=inv_area),
                out_shape=jax.ShapeDtypeStruct((nc, kron_cols), x.dtype),
                grid_spec=pltpu.PrefetchScalarGridSpec(
                    num_scalar_prefetch=0,
                    grid=(steps,),
                    in_specs=[
                        pl.BlockSpec((b, h * w), lambda i: (i, 0)),
                        _const_spec((h * w, kron_cols), single_buffer_consts),
                    ],
                    out_specs=pl.BlockSpec((b, kron_cols), lambda i: (i, 0)),
                ),
                compiler_params=pltpu.CompilerParams(
                    dimension_semantics=("parallel",),
                    vmem_limit_bytes=vmem_limit),
            )(xr, kmat)

        try:
            out = run(True)                # constants single-buffered
        except Exception:
            out = run(False)               # fallback: default double-buffering
        if kron_cols != oh * ow:
            out = out[:, :oh * ow]
        return out.reshape(n, c, oh, ow)

    # ---- large planes: separable two-matmul path, B planes per grid step ----
    # TODO(synk): for very large planes with small k1/k2 a shift-and-add box
    # sum (VPU/XLU) would stay HBM-bound, and planes that do not fit VMEM
    # would additionally need spatial tiling.
    ohp = _round_up(oh, 8)                 # sublane-dense output rows
    owp = _round_up(ow, 128)               # lane-dense output stores
    ml_p = np.zeros((ohp, h), np.float32)
    ml_p[:oh] = ml_np
    mr_p = np.zeros((w, owp), np.float32)
    mr_p[:, :ow] = mr_np
    ml_j = jnp.asarray(ml_p, dtype=jnp.float32)   # left matmul stays f32
    mr_j = jnp.asarray(mr_p, dtype=mat_dtype)     # 0/1 exact in bf16

    flatten_rhs = (h % pack == 0)          # dtype-aware layout-clean reshape
    mats_bytes = ohp * h * 4 + w * owp * mat_itemsize
    bytes_per_plane = 2 * (h * w + ohp * owp) * itemsize
    if flatten_rhs:
        bytes_per_plane += h * owp * 4     # f32 intermediate scratch per plane

    cap = _SEP_PLANE_CAP if max_planes_per_step is None else int(max_planes_per_step)
    b, steps = _choose_batch(
        nc, bytes_per_plane, 2 * mats_bytes, cap=cap, align=pack,
        budget=block_budget, multi_tc=multi_tc, require_align=False)
    xr = x.reshape(nc, h, w)
    needed = b * bytes_per_plane + 2 * mats_bytes + _HEADROOM_BYTES
    vmem_limit = int(min(max(needed, 32 << 20), vmem_cap))

    if flatten_rhs:
        kernel = functools.partial(_pool_kernel_sep_flat, inv_area=inv_area,
                                   unroll=2)
        scratch = [pltpu.VMEM((b * h, owp), jnp.float32)]
    else:
        kernel = functools.partial(_pool_kernel_sep, inv_area=inv_area, unroll=2)
        scratch = []

    def run(single_buffer_consts):
        return pl.pallas_call(
            kernel,
            out_shape=jax.ShapeDtypeStruct((nc, ohp, owp), x.dtype),
            grid_spec=pltpu.PrefetchScalarGridSpec(
                num_scalar_prefetch=0,
                grid=(steps,),
                in_specs=[
                    pl.BlockSpec((b, h, w), lambda i: (i, 0, 0)),
                    _const_spec((ohp, h), single_buffer_consts),
                    _const_spec((w, owp), single_buffer_consts),
                ],
                out_specs=pl.BlockSpec((b, ohp, owp), lambda i: (i, 0, 0)),
                scratch_shapes=scratch,
            ),
            compiler_params=pltpu.CompilerParams(
                dimension_semantics=("parallel",),
                vmem_limit_bytes=vmem_limit),
        )(xr, ml_j, mr_j)

    try:
        out = run(True)
    except Exception:
        out = run(False)
    if (ohp, owp) != (oh, ow):
        out = out[:, :oh, :ow]
    return out.reshape(n, c, oh, ow)


# ----------------------------------------------------------------------------
# Pure-JAX reference (port of the PyTorch cumsum formulation)
# ----------------------------------------------------------------------------
def _reference(x, k1, k2, auto_pad=True):
    n, c, h, w = x.shape
    s = jnp.cumsum(jnp.cumsum(x, axis=-1), axis=-2)
    s = jnp.pad(s, ((0, 0), (0, 0), (1, 0), (1, 0)))
    s1, s2 = s[:, :, :-k1, :-k2], s[:, :, :-k1, k2:]
    s3, s4 = s[:, :, k1:, :-k2], s[:, :, k1:, k2:]
    out = (s4 + s1 - s2 - s3) / (k1 * k2)
    if auto_pad:
        _h, _w = out.shape[2:]
        pad = ((0, 0), (0, 0),
               ((h - _h) // 2, (h - _h + 1) // 2),
               ((w - _w) // 2, (w - _w + 1) // 2))
        out = jnp.pad(out, pad, mode='edge')
    return out


if __name__ == "__main__":
    key = jax.random.PRNGKey(0)

    # 1) Small plane -> kron (single lane-dense matmul) path, f32.
    x = jax.random.normal(key, (2, 4, 16, 16), dtype=jnp.float32)
    out = jax.block_until_ready(avg_pool2d_tlc(x, kernel_size=[7, 5], auto_pad=True))
    ref = _reference(x, 7, 5, auto_pad=True)
    assert out.shape == (2, 4, 16, 16), out.shape
    np.testing.assert_allclose(np.asarray(out), np.asarray(ref), rtol=1e-5, atol=1e-5)

    # 2) Larger plane -> separable (two-matmul, batched planes) path.
    x2 = jax.random.normal(jax.random.PRNGKey(1), (1, 3, 40, 48), dtype=jnp.float32)
    out2 = jax.block_until_ready(avg_pool2d_tlc(x2, kernel_size=[9, 11], auto_pad=True))
    ref2 = _reference(x2, 9, 11, auto_pad=True)
    assert out2.shape == (1, 3, 40, 48), out2.shape
    np.testing.assert_allclose(np.asarray(out2), np.asarray(ref2), rtol=1e-5, atol=1e-5)

    # 3) bf16 input stays bf16 end-to-end (f32 MXU accumulation).
    xb = x.astype(jnp.bfloat16)
    outb = jax.block_until_ready(avg_pool2d_tlc(xb, kernel_size=[7, 5], auto_pad=True))
    assert outb.dtype == jnp.bfloat16, outb.dtype
    np.testing.assert_allclose(np.asarray(outb, dtype=np.float32), np.asarray(ref),
                               rtol=5e-2, atol=5e-2)

    # 4) Multi-step grid with a ragged final block (kron path, nc=20, b=8).
    x4 = jax.random.normal(jax.random.PRNGKey(2), (5, 4, 16, 16), dtype=jnp.float32)
    out4 = jax.block_until_ready(
        avg_pool2d_tlc(x4, kernel_size=[7, 5], auto_pad=True, max_planes_per_step=8))
    ref4 = _reference(x4, 7, 5, auto_pad=True)
    np.testing.assert_allclose(np.asarray(out4), np.asarray(ref4), rtol=1e-5, atol=1e-5)

    # 5) Multi-step grid on the separable path.
    x5 = jax.random.normal(jax.random.PRNGKey(3), (2, 3, 40, 48), dtype=jnp.float32)
    out5 = jax.block_until_ready(
        avg_pool2d_tlc(x5, kernel_size=[9, 11], auto_pad=True, max_planes_per_step=4))
    ref5 = _reference(x5, 9, 11, auto_pad=True)
    np.testing.assert_allclose(np.asarray(out5), np.asarray(ref5), rtol=1e-5, atol=1e-5)

    print("KERNEL_OK")
</pallas_src>

<mosaic_0001>
module attributes {stable_mosaic.version = 11 : i64} {
  func.func @_pool_kernel_kron(%arg0: i32, %arg1: memref<8x256xf32, #tpu.memory_space<vmem>>, %arg2: memref<256x256xf32, #tpu.memory_space<vmem>>, %arg3: memref<8x256xf32, #tpu.memory_space<vmem>>) attributes {dimension_semantics = [#tpu.dimension_semantics<parallel>], iteration_bounds = array<i64: 1>, scalar_prefetch = 0 : i64, scratch_operands = 0 : i64, tpu.core_type = #tpu.core_type<tc>, window_params = [{transform_indices = @transform_0, window_bounds = array<i64: 8, 256>}, {pipeline_mode = #tpu.pipeline_mode<synchronous>, transform_indices = @transform_1, window_bounds = array<i64: 256, 256>}, {transform_indices = @transform_2, window_bounds = array<i64: 8, 256>}]} {
    %c0 = arith.constant 0 : index
    %c0_0 = arith.constant 0 : index
    %0 = vector.load %arg1[%c0, %c0_0] : memref<8x256xf32, #tpu.memory_space<vmem>>, vector<8x256xf32>
    %c0_1 = arith.constant 0 : index
    %c0_2 = arith.constant 0 : index
    %1 = vector.load %arg2[%c0_1, %c0_2] : memref<256x256xf32, #tpu.memory_space<vmem>>, vector<256x256xf32>
    %cst = arith.constant dense<0.000000e+00> : vector<8x256xf32>
    %2 = tpu.matmul %0, %1, %cst {dimension_numbers = #tpu.dot_dimension_numbers<[1], [0], [0], [1], [0, 0, 1, 1], [], []>} : vector<8x256xf32>, vector<256x256xf32>, vector<8x256xf32> -> vector<8x256xf32>
    %cst_3 = arith.constant 0.0285714287 : f32
    %3 = vector.broadcast %cst_3 : f32 to vector<8x256xf32>
    %4 = arith.mulf %2, %3 : vector<8x256xf32>
    %c0_4 = arith.constant 0 : index
    %c0_5 = arith.constant 0 : index
    %5 = vector.load %arg3[%c0_4, %c0_5] : memref<8x256xf32, #tpu.memory_space<vmem>>, vector<8x256xf32>
    tpu.vector_store %arg3[%c0_4, %c0_5], %4 {strides = array<i32>} : memref<8x256xf32, #tpu.memory_space<vmem>>, vector<8x256xf32>,
    return
  }
  func.func @transform_0(%arg0: i32) -> (i32, i32) {
    %c0_i32 = arith.constant 0 : i32
    %c0_i32_0 = arith.constant 0 : i32
    return %arg0, %c0_i32 : i32, i32
  }
  func.func @transform_1(%arg0: i32) -> (i32, i32) {
    %c0_i32 = arith.constant 0 : i32
    %c0_i32_0 = arith.constant 0 : i32
    %c0_i32_1 = arith.constant 0 : i32
    return %c0_i32, %c0_i32_0 : i32, i32
  }
  func.func @transform_2(%arg0: i32) -> (i32, i32) {
    %c0_i32 = arith.constant 0 : i32
    %c0_i32_0 = arith.constant 0 : i32
    return %arg0, %c0_i32 : i32, i32
  }
}

module attributes {stable_mosaic.version = 11 : i64} {
  func.func @_pool_kernel_kron(%arg0: i32, %arg1: memref<8x256xf32, #tpu.memory_space<vmem>>, %arg2: memref<256x256xf32, #tpu.memory_space<vmem>>, %arg3: memref<8x256xf32, #tpu.memory_space<vmem>>) attributes {dimension_semantics = [#tpu.dimension_semantics<parallel>], iteration_bounds = array<i64: 1>, scalar_prefetch = 0 : i64, scratch_operands = 0 : i64, tpu.core_type = #tpu.core_type<tc>, window_params = [{transform_indices = @transform_0, window_bounds = array<i64: 8, 256>}, {pipeline_mode = #tpu.pipeline_mode<synchronous>, transform_indices = @transform_1, window_bounds = array<i64: 256, 256>}, {transform_indices = @transform_2, window_bounds = array<i64: 8, 256>}]} {
    %c0 = arith.constant 0 : index
    %c0_0 = arith.constant 0 : index
    %0 = vector.load %arg1[%c0, %c0_0] : memref<8x256xf32, #tpu.memory_space<vmem>>, vector<8x256xf32>
    %c0_1 = arith.constant 0 : index
    %c0_2 = arith.constant 0 : index
    %1 = vector.load %arg2[%c0_1, %c0_2] : memref<256x256xf32, #tpu.memory_space<vmem>>, vector<256x256xf32>
    %cst = arith.constant dense<0.000000e+00> : vector<8x256xf32>
    %2 = tpu.matmul %0, %1, %cst {dimension_numbers = #tpu.dot_dimension_numbers<[1], [0], [0], [1], [0, 0, 1, 1], [], []>} : vector<8x256xf32>, vector<256x256xf32>, vector<8x256xf32> -> vector<8x256xf32>
    %cst_3 = arith.constant 0.0285714287 : f32
    %3 = vector.broadcast %cst_3 : f32 to vector<8x256xf32>
    %4 = arith.mulf %2, %3 : vector<8x256xf32>
    %c0_4 = arith.constant 0 : index
    %c0_5 = arith.constant 0 : index
    %5 = vector.load %arg3[%c0_4, %c0_5] : memref<8x256xf32, #tpu.memory_space<vmem>>, vector<8x256xf32>
    tpu.vector_store %arg3[%c0_4, %c0_5], %4 {strides = array<i32>} : memref<8x256xf32, #tpu.memory_space<vmem>>, vector<8x256xf32>,
    return
  }
  func.func @transform_0(%arg0: i32) -> (i32, i32) {
    %c0_i32 = arith.constant 0 : i32
    %c0_i32_0 = arith.constant 0 : i32
    return %arg0, %c0_i32 : i32, i32
  }
  func.func @transform_1(%arg0: i32) -> (i32, i32) {
    %c0_i32 = arith.constant 0 : i32
    %c0_i32_0 = arith.constant 0 : i32
    %c0_i32_1 = arith.constant 0 : i32
    return %c0_i32, %c0_i32_0 : i32, i32
  }
  func.func @transform_2(%arg0: i32) -> (i32, i32) {
    %c0_i32 = arith.constant 0 : i32
    %c0_i32_0 = arith.constant 0 : i32
    return %arg0, %c0_i32 : i32, i32
  }
}

</mosaic_0001>

<bundles_post_ra>
// kernel: tpu_custom_call.1
= control target key start
LH: loop header
LB: loop body
LE: loop exit
PB: predicated region body
PF: predicated region fallthrough
CT: control target
= control target key end

     0   :  { %7 = vsyncpa [#allocation3], 0  ;;  %s322_s0 = inlined_call_operand.hbm [shape: f32[8,256], index: 0, kind: input, shape index: {}]   ;;  %s323_s1 = inlined_call_operand.hbm [shape: f32[256,256], index: 1, kind: input, shape index: {}]   ;;  %s324_s2 = inlined_call_operand.hbm [shape: f32[8,256], index: 2, kind: output, shape index: {}]  }
   0x1   :  { %8 = vsyncpa [#allocation6], 0 }
   0x2   :  { %9 = vsyncpa [#allocation4], 0  ;;  %s15_s11 = sshll.u32 %s322_s0, 4  ;;  %s293_s12 = smov [#allocation2]   ;;  %s16_s11 = int_to_ptr.hbm [resolvable:$true] %s15_s11 }
   0x3   :  { %s17_s13 = sshll.u32 %s293_s12, 4  ;;  %s25_s16 = sshll.u32 %s323_s1, 4  ;;  %s18_s13 = int_to_ptr.vmem [resolvable:$true] %s17_s13  ;;  %s26_s16 = int_to_ptr.hbm [resolvable:$true] %s25_s16 }
   0x4   :  { %20 = dma.hbm_to_vmem [thread:$0]  %s16_s11, 256, %s18_s13, [#allocation3]  }
   0x5   :  { %s294_s17 = smov [#allocation5]   ;;  %s295_s19 = smov 256  }
   0x6   :  { %s27_s18 = sshll.u32 %s294_s17, 4  ;;  %s296_s20 = smov 16   ;;  %s28_s18 = int_to_ptr.vmem [resolvable:$true] %s27_s18 }
   0x7   :  { %33 = dma.hbm_to_vmem [thread:$0]  %s26_s16, 8192, %s28_s18, [#allocation6], %s295_s19, %s295_s19, %s296_s20  }
   0x8   :  { %287 = dma.done.wait [#allocation3], 256  }
   0x9   :  { %288 = vsyncadd [#allocation3], 4294967040 }
   0xa   :  { %289 = dma.done.wait [#allocation6], 8192  }
   0xb   :  { %290 = vsyncadd [#allocation6], 4294959104  ;;  %v75_v0 = vld [vmem:[#allocation5 + $0xf8] sm:$0xff]  ;;  %v73_v2 = vld [vmem:[#allocation5 + $0xe8] sm:$0xff]  ;;  %s297_s0 = smov [#allocation7]   ;;  %s199_s23 = sshll.u32 %s324_s2, 4  ;;  %s200_s23 = int_to_ptr.hbm [resolvable:$true] %s199_s23 }
   0xc   :  { %v107_v1 = vld [vmem:[#allocation5 + $0x1f8] sm:$0xff]  ;;  %148 = vmatpush.msra.mxu2 %v75_v0  ;;  %v105_v3 = vld [vmem:[#allocation5 + $0x1e8] sm:$0xff]  ;;  %v74_v6 = vld [vmem:[#allocation5 + $0xf0] sm:$0xff]  ;;  %s197_s1 = sshll.u32 %s297_s0, 4  ;;  %s198_s1 = int_to_ptr.vmem [resolvable:$true] %s197_s1 }
   0xd   :  { %168 = vmatpush.msra.mxu3 %v107_v1  ;;  %v71_v4 = vld [vmem:[#allocation5 + $0xd8] sm:$0xff]  ;;  %v106_v7 = vld [vmem:[#allocation5 + $0x1f0] sm:$0xff]  ;;  %v72_v8 = vld [vmem:[#allocation5 + $0xe0] sm:$0xff]  ;;  %108 = vmatpush.msra.mxu0 %v74_v6 }
   0xe   :  { %v103_v5 = vld [vmem:[#allocation5 + $0x1d8] sm:$0xff]  ;;  %149 = vmatpush.msra.mxu2 %v73_v2  ;;  %v104_v9 = vld [vmem:[#allocation5 + $0x1e0] sm:$0xff]  ;;  %128 = vmatpush.msra.mxu1 %v106_v7  ;;  %v69_v10 = vld [vmem:[#allocation5 + $0xc8] sm:$0xff] }
   0xf   :  { %169 = vmatpush.msra.mxu3 %v105_v3  ;;  %v101_v11 = vld [vmem:[#allocation5 + $0x1c8] sm:$0xff]  ;;  %v70_v12 = vld [vmem:[#allocation5 + $0xd0] sm:$0xff]  ;;  %109 = vmatpush.msra.mxu0 %v72_v8  ;;  %v67_v14 = vld [vmem:[#allocation5 + $0xb8] sm:$0xff] }
  0x10   :  { %150 = vmatpush.msra.mxu2 %v71_v4  ;;  %v102_v13 = vld [vmem:[#allocation5 + $0x1d0] sm:$0xff]  ;;  %129 = vmatpush.msra.mxu1 %v104_v9  ;;  %v99_v15 = vld [vmem:[#allocation5 + $0x1b8] sm:$0xff]  ;;  %v68_v16 = vld [vmem:[#allocation5 + $0xc0] sm:$0xff] }
  0x11   :  { %170 = vmatpush.msra.mxu3 %v103_v5  ;;  %v100_v17 = vld [vmem:[#allocation5 + $0x1c0] sm:$0xff]  ;;  %110 = vmatpush.msra.mxu0 %v70_v12  ;;  %v65_v18 = vld [vmem:[#allocation5 + $0xa8] sm:$0xff]  ;;  %v66_v20 = vld [vmem:[#allocation5 + $0xb0] sm:$0xff] }
  0x12   :  { %151 = vmatpush.msra.mxu2 %v69_v10  ;;  %130 = vmatpush.msra.mxu1 %v102_v13  ;;  %v97_v19 = vld [vmem:[#allocation5 + $0x1a8] sm:$0xff]  ;;  %v98_v21 = vld [vmem:[#allocation5 + $0x1b0] sm:$0xff]  ;;  %v63_v22 = vld [vmem:[#allocation5 + $0x98] sm:$0xff] }
  0x13   :  { %171 = vmatpush.msra.mxu3 %v101_v11  ;;  %111 = vmatpush.msra.mxu0 %v68_v16  ;;  %v95_v23 = vld [vmem:[#allocation5 + $0x198] sm:$0xff]  ;;  %v64_v24 = vld [vmem:[#allocation5 + $0xa0] sm:$0xff]  ;;  %v61_v26 = vld [vmem:[#allocation5 + $0x88] sm:$0xff] }
  0x14   :  { %152 = vmatpush.msra.mxu2 %v67_v14  ;;  %131 = vmatpush.msra.mxu1 %v100_v17  ;;  %v96_v25 = vld [vmem:[#allocation5 + $0x1a0] sm:$0xff]  ;;  %v93_v27 = vld [vmem:[#allocation5 + $0x188] sm:$0xff]  ;;  %v62_v28 = vld [vmem:[#allocation5 + $0x90] sm:$0xff] }
  0x15   :  { %172 = vmatpush.msra.mxu3 %v99_v15  ;;  %112 = vmatpush.msra.mxu0 %v66_v20  ;;  %v94_v29 = vld [vmem:[#allocation5 + $0x190] sm:$0xff]  ;;  %v59_v30 = vld [vmem:[#allocation5 + $0x78] sm:$0xff]  ;;  %v60_v32 = vld [vmem:[#allocation5 + $0x80] sm:$0xff] }
  0x16   :  { %153 = vmatpush.msra.mxu2 %v65_v18  ;;  %132 = vmatpush.msra.mxu1 %v98_v21  ;;  %v91_v31 = vld [vmem:[#allocation5 + $0x178] sm:$0xff]  ;;  %v92_v33 = vld [vmem:[#allocation5 + $0x180] sm:$0xff]  ;;  %v57_v34 = vld [vmem:[#allocation5 + $0x68] sm:$0xff] }
  0x17   :  { %173 = vmatpush.msra.mxu3 %v97_v19  ;;  %113 = vmatpush.msra.mxu0 %v64_v24  ;;  %v89_v35 = vld [vmem:[#allocation5 + $0x168] sm:$0xff]  ;;  %v58_v36 = vld [vmem:[#allocation5 + $0x70] sm:$0xff]  ;;  %v55_v38 = vld [vmem:[#allocation5 + $0x58] sm:$0xff] }
  0x18   :  { %154 = vmatpush.msra.mxu2 %v63_v22  ;;  %133 = vmatpush.msra.mxu1 %v96_v25  ;;  %v90_v37 = vld [vmem:[#allocation5 + $0x170] sm:$0xff]  ;;  %v87_v39 = vld [vmem:[#allocation5 + $0x158] sm:$0xff]  ;;  %v56_v40 = vld [vmem:[#allocation5 + $0x60] sm:$0xff] }
  0x19   :  { %174 = vmatpush.msra.mxu3 %v95_v23  ;;  %114 = vmatpush.msra.mxu0 %v62_v28  ;;  %v88_v41 = vld [vmem:[#allocation5 + $0x160] sm:$0xff]  ;;  %v53_v42 = vld [vmem:[#allocation5 + $0x48] sm:$0xff]  ;;  %v54_v44 = vld [vmem:[#allocation5 + $0x50] sm:$0xff] }
  0x1a   :  { %155 = vmatpush.msra.mxu2 %v61_v26  ;;  %134 = vmatpush.msra.mxu1 %v94_v29  ;;  %v85_v43 = vld [vmem:[#allocation5 + $0x148] sm:$0xff]  ;;  %v86_v45 = vld [vmem:[#allocation5 + $0x150] sm:$0xff]  ;;  %v51_v46 = vld [vmem:[#allocation5 + $0x38] sm:$0xff] }
  0x1b   :  { %175 = vmatpush.msra.mxu3 %v93_v27  ;;  %115 = vmatpush.msra.mxu0 %v60_v32  ;;  %v83_v47 = vld [vmem:[#allocation5 + $0x138] sm:$0xff]  ;;  %v52_v48 = vld [vmem:[#allocation5 + $0x40] sm:$0xff]  ;;  %v49_v50 = vld [vmem:[#allocation5 + $0x28] sm:$0xff] }
  0x1c   :  { %156 = vmatpush.msra.mxu2 %v59_v30  ;;  %135 = vmatpush.msra.mxu1 %v92_v33  ;;  %v84_v49 = vld [vmem:[#allocation5 + $0x140] sm:$0xff]  ;;  %v81_v51 = vld [vmem:[#allocation5 + $0x128] sm:$0xff]  ;;  %v50_v52 = vld [vmem:[#allocation5 + $0x30] sm:$0xff] }
  0x1d   :  { %176 = vmatpush.msra.mxu3 %v91_v31  ;;  %116 = vmatpush.msra.mxu0 %v58_v36  ;;  %v82_v53 = vld [vmem:[#allocation5 + $0x130] sm:$0xff]  ;;  %v47_v54 = vld [vmem:[#allocation5 + $0x18] sm:$0xff]  ;;  %v48_v56 = vld [vmem:[#allocation5 + $0x20] sm:$0xff] }
  0x1e   :  { %157 = vmatpush.msra.mxu2 %v57_v34  ;;  %136 = vmatpush.msra.mxu1 %v90_v37  ;;  %v79_v55 = vld [vmem:[#allocation5 + $0x118] sm:$0xff]  ;;  %v80_v57 = vld [vmem:[#allocation5 + $0x120] sm:$0xff]  ;;  %v45_v58 = vld [vmem:[#allocation5 + $0x8] sm:$0xff] }
  0x1f   :  { %177 = vmatpush.msra.mxu3 %v89_v35  ;;  %117 = vmatpush.msra.mxu0 %v56_v40  ;;  %v77_v59 = vld [vmem:[#allocation5 + $0x108] sm:$0xff]  ;;  %v42_v60 = vld [vmem:[#allocation2] sm:$0xff]  ;;  %v43_v61 = vld [vmem:[#allocation2 + $0x8] sm:$0xff] }
  0x20   :  { %158 = vmatpush.msra.mxu2 %v55_v38  ;;  %137 = vmatpush.msra.mxu1 %v88_v41  ;;  %v46_v62 = vld [vmem:[#allocation5 + $0x10] sm:$0xff]  ;;  %v44_v0 = vld [vmem:[#allocation5] sm:$0xff] }
  0x21   :  { %178 = vmatpush.msra.mxu3 %v87_v39  ;;  %118 = vmatpush.msra.mxu0 %v54_v44  ;;  %v78_v63 = vld [vmem:[#allocation5 + $0x110] sm:$0xff]  ;;  %v76_v1 = vld [vmem:[#allocation5 + $0x100] sm:$0xff] }
  0x22   :  { %159 = vmatpush.msra.mxu2 %v53_v42  ;;  %138 = vmatpush.msra.mxu1 %v86_v45 }
  0x23   :  { %179 = vmatpush.msra.mxu3 %v85_v43  ;;  %119 = vmatpush.msra.mxu0 %v52_v48 }
  0x24   :  { %160 = vmatpush.msra.mxu2 %v51_v46  ;;  %139 = vmatpush.msra.mxu1 %v84_v49 }
  0x25   :  { %180 = vmatpush.msra.mxu3 %v83_v47  ;;  %120 = vmatpush.msra.mxu0 %v50_v52 }
  0x26   :  { %161 = vmatpush.msra.mxu2 %v49_v50  ;;  %140 = vmatpush.msra.mxu1 %v82_v53 }
  0x27   :  { %181 = vmatpush.msra.mxu3 %v81_v51  ;;  %121 = vmatpush.msra.mxu0 %v48_v56 }
  0x28   :  { %162 = vmatpush.msra.mxu2 %v47_v54  ;;  %141 = vmatpush.msra.mxu1 %v80_v57 }
  0x29   :  { %182 = vmatpush.msra.mxu3 %v79_v55  ;;  %122 = vmatpush.msra.mxu0 %v46_v62 }
  0x2a   :  { %163 = vmatpush.msra.mxu2 %v45_v58  ;;  %142 = vmatpush.msra.mxu1 %v78_v63 }
  0x2b   :  { %183 = vmatpush.msra.mxu3 %v77_v59  ;;  %164 = vmatmul.f32.vlgmr.msra.gmra.mxu2 %v42_v60 }
  0x2c   :  { %184 = vmatmul.f32.vlgmr.msra.gmra.mxu3 %v43_v61  ;;  %123 = vmatpush.msra.mxu0 %v44_v0 }
  0x2d   :  { %143 = vmatpush.msra.mxu1 %v76_v1  ;;  %124 = vmatmul.f32.vlgmr.msra.gmra.mxu0 %v42_v60 }
  0x2e   :  { %144 = vmatmul.f32.vlgmr.msra.gmra.mxu1 %v43_v61 }
  0xaa   :  { %v125_v2 = vpop.f32.mrf.mxu0 }
  0xab   :  { %v145_v3 = vpop.f32.mrf.mxu1 }
  0xac   :  { %v146_v4 = vadd.f32 %v145_v3, %v125_v2 }
  0xae   :  { %v165_v5 = vpop.f32.mrf.mxu2  ;;  %v188_v7 = vmul.f32 0.028571429, %v146_v4 }
  0xaf   :  { %v185_v6 = vpop.f32.mrf.mxu3 }
  0xb0   :  { %v186_v8 = vadd.f32 %v185_v6, %v165_v5  ;;  %190 = vst [vmem:[#allocation7] sm:$0xff] %v188_v7 }
  0xb2   :  { %v189_v9 = vmul.f32 0.028571429, %v186_v8 }
  0xb4   :  { %191 = vst [vmem:[#allocation7 + $0x8] sm:$0xff] %v189_v9 }
  0xb5   :  { %202 = dma.vmem_to_hbm [thread:$0]  %s198_s1, 256, %s200_s23, [#allocation4]  }
  0xb6   :  { %291 = dma.done.wait [#allocation4], 256  }
  0xb7   :  { %292 = vsyncadd [#allocation4], 4294967040 }
  0xb8   :  { %207 = vsyncpa [#allocation3], 1 }
  0xb9   :  { %208 = vsyncpa [#allocation6], 1 }
  0xba   :  { %209 = vsyncpa [#allocation4], 1 }

// kernel: tpu_custom_call.1
= control target key start
LH: loop header
LB: loop body
LE: loop exit
PB: predicated region body
PF: predicated region fallthrough
CT: control target
= control target key end

     0   :  { %7 = vsyncpa [#allocation3], 0  ;;  %s322_s0 = inlined_call_operand.hbm [shape: f32[8,256], index: 0, kind: input, shape index: {}]   ;;  %s323_s1 = inlined_call_operand.hbm [shape: f32[256,256], index: 1, kind: input, shape index: {}]   ;;  %s324_s2 = inlined_call_operand.hbm [shape: f32[8,256], index: 2, kind: output, shape index: {}]  }
   0x1   :  { %8 = vsyncpa [#allocation6], 0 }
   0x2   :  { %9 = vsyncpa [#allocation4], 0  ;;  %s15_s11 = sshll.u32 %s322_s0, 4  ;;  %s293_s12 = smov [#allocation2]   ;;  %s16_s11 = int_to_ptr.hbm [resolvable:$true] %s15_s11 }
   0x3   :  { %s17_s13 = sshll.u32 %s293_s12, 4  ;;  %s25_s16 = sshll.u32 %s323_s1, 4  ;;  %s18_s13 = int_to_ptr.vmem [resolvable:$true] %s17_s13  ;;  %s26_s16 = int_to_ptr.hbm [resolvable:$true] %s25_s16 }
   0x4   :  { %20 = dma.hbm_to_vmem [thread:$0]  %s16_s11, 256, %s18_s13, [#allocation3]  }
   0x5   :  { %s294_s17 = smov [#allocation5]   ;;  %s295_s19 = smov 256  }
   0x6   :  { %s27_s18 = sshll.u32 %s294_s17, 4  ;;  %s296_s20 = smov 16   ;;  %s28_s18 = int_to_ptr.vmem [resolvable:$true] %s27_s18 }
   0x7   :  { %33 = dma.hbm_to_vmem [thread:$0]  %s26_s16, 8192, %s28_s18, [#allocation6], %s295_s19, %s295_s19, %s296_s20  }
   0x8   :  { %287 = dma.done.wait [#allocation3], 256  }
   0x9   :  { %288 = vsyncadd [#allocation3], 4294967040 }
   0xa   :  { %289 = dma.done.wait [#allocation6], 8192  }
   0xb   :  { %290 = vsyncadd [#allocation6], 4294959104  ;;  %v75_v0 = vld [vmem:[#allocation5 + $0xf8] sm:$0xff]  ;;  %v73_v2 = vld [vmem:[#allocation5 + $0xe8] sm:$0xff]  ;;  %s297_s0 = smov [#allocation7]   ;;  %s199_s23 = sshll.u32 %s324_s2, 4  ;;  %s200_s23 = int_to_ptr.hbm [resolvable:$true] %s199_s23 }
   0xc   :  { %v107_v1 = vld [vmem:[#allocation5 + $0x1f8] sm:$0xff]  ;;  %148 = vmatpush.msra.mxu2 %v75_v0  ;;  %v105_v3 = vld [vmem:[#allocation5 + $0x1e8] sm:$0xff]  ;;  %v74_v6 = vld [vmem:[#allocation5 + $0xf0] sm:$0xff]  ;;  %s197_s1 = sshll.u32 %s297_s0, 4  ;;  %s198_s1 = int_to_ptr.vmem [resolvable:$true] %s197_s1 }
   0xd   :  { %168 = vmatpush.msra.mxu3 %v107_v1  ;;  %v71_v4 = vld [vmem:[#allocation5 + $0xd8] sm:$0xff]  ;;  %v106_v7 = vld [vmem:[#allocation5 + $0x1f0] sm:$0xff]  ;;  %v72_v8 = vld [vmem:[#allocation5 + $0xe0] sm:$0xff]  ;;  %108 = vmatpush.msra.mxu0 %v74_v6 }
   0xe   :  { %v103_v5 = vld [vmem:[#allocation5 + $0x1d8] sm:$0xff]  ;;  %149 = vmatpush.msra.mxu2 %v73_v2  ;;  %v104_v9 = vld [vmem:[#allocation5 + $0x1e0] sm:$0xff]  ;;  %128 = vmatpush.msra.mxu1 %v106_v7  ;;  %v69_v10 = vld [vmem:[#allocation5 + $0xc8] sm:$0xff] }
   0xf   :  { %169 = vmatpush.msra.mxu3 %v105_v3  ;;  %v101_v11 = vld [vmem:[#allocation5 + $0x1c8] sm:$0xff]  ;;  %v70_v12 = vld [vmem:[#allocation5 + $0xd0] sm:$0xff]  ;;  %109 = vmatpush.msra.mxu0 %v72_v8  ;;  %v67_v14 = vld [vmem:[#allocation5 + $0xb8] sm:$0xff] }
  0x10   :  { %150 = vmatpush.msra.mxu2 %v71_v4  ;;  %v102_v13 = vld [vmem:[#allocation5 + $0x1d0] sm:$0xff]  ;;  %129 = vmatpush.msra.mxu1 %v104_v9  ;;  %v99_v15 = vld [vmem:[#allocation5 + $0x1b8] sm:$0xff]  ;;  %v68_v16 = vld [vmem:[#allocation5 + $0xc0] sm:$0xff] }
  0x11   :  { %170 = vmatpush.msra.mxu3 %v103_v5  ;;  %v100_v17 = vld [vmem:[#allocation5 + $0x1c0] sm:$0xff]  ;;  %110 = vmatpush.msra.mxu0 %v70_v12  ;;  %v65_v18 = vld [vmem:[#allocation5 + $0xa8] sm:$0xff]  ;;  %v66_v20 = vld [vmem:[#allocation5 + $0xb0] sm:$0xff] }
  0x12   :  { %151 = vmatpush.msra.mxu2 %v69_v10  ;;  %130 = vmatpush.msra.mxu1 %v102_v13  ;;  %v97_v19 = vld [vmem:[#allocation5 + $0x1a8] sm:$0xff]  ;;  %v98_v21 = vld [vmem:[#allocation5 + $0x1b0] sm:$0xff]  ;;  %v63_v22 = vld [vmem:[#allocation5 + $0x98] sm:$0xff] }
  0x13   :  { %171 = vmatpush.msra.mxu3 %v101_v11  ;;  %111 = vmatpush.msra.mxu0 %v68_v16  ;;  %v95_v23 = vld [vmem:[#allocation5 + $0x198] sm:$0xff]  ;;  %v64_v24 = vld [vmem:[#allocation5 + $0xa0] sm:$0xff]  ;;  %v61_v26 = vld [vmem:[#allocation5 + $0x88] sm:$0xff] }
  0x14   :  { %152 = vmatpush.msra.mxu2 %v67_v14  ;;  %131 = vmatpush.msra.mxu1 %v100_v17  ;;  %v96_v25 = vld [vmem:[#allocation5 + $0x1a0] sm:$0xff]  ;;  %v93_v27 = vld [vmem:[#allocation5 + $0x188] sm:$0xff]  ;;  %v62_v28 = vld [vmem:[#allocation5 + $0x90] sm:$0xff] }
  0x15   :  { %172 = vmatpush.msra.mxu3 %v99_v15  ;;  %112 = vmatpush.msra.mxu0 %v66_v20  ;;  %v94_v29 = vld [vmem:[#allocation5 + $0x190] sm:$0xff]  ;;  %v59_v30 = vld [vmem:[#allocation5 + $0x78] sm:$0xff]  ;;  %v60_v32 = vld [vmem:[#allocation5 + $0x80] sm:$0xff] }
  0x16   :  { %153 = vmatpush.msra.mxu2 %v65_v18  ;;  %132 = vmatpush.msra.mxu1 %v98_v21  ;;  %v91_v31 = vld [vmem:[#allocation5 + $0x178] sm:$0xff]  ;;  %v92_v33 = vld [vmem:[#allocation5 + $0x180] sm:$0xff]  ;;  %v57_v34 = vld [vmem:[#allocation5 + $0x68] sm:$0xff] }
  0x17   :  { %173 = vmatpush.msra.mxu3 %v97_v19  ;;  %113 = vmatpush.msra.mxu0 %v64_v24  ;;  %v89_v35 = vld [vmem:[#allocation5 + $0x168] sm:$0xff]  ;;  %v58_v36 = vld [vmem:[#allocation5 + $0x70] sm:$0xff]  ;;  %v55_v38 = vld [vmem:[#allocation5 + $0x58] sm:$0xff] }
  0x18   :  { %154 = vmatpush.msra.mxu2 %v63_v22  ;;  %133 = vmatpush.msra.mxu1 %v96_v25  ;;  %v90_v37 = vld [vmem:[#allocation5 + $0x170] sm:$0xff]  ;;  %v87_v39 = vld [vmem:[#allocation5 + $0x158] sm:$0xff]  ;;  %v56_v40 = vld [vmem:[#allocation5 + $0x60] sm:$0xff] }
  0x19   :  { %174 = vmatpush.msra.mxu3 %v95_v23  ;;  %114 = vmatpush.msra.mxu0 %v62_v28  ;;  %v88_v41 = vld [vmem:[#allocation5 + $0x160] sm:$0xff]  ;;  %v53_v42 = vld [vmem:[#allocation5 + $0x48] sm:$0xff]  ;;  %v54_v44 = vld [vmem:[#allocation5 + $0x50] sm:$0xff] }
  0x1a   :  { %155 = vmatpush.msra.mxu2 %v61_v26  ;;  %134 = vmatpush.msra.mxu1 %v94_v29  ;;  %v85_v43 = vld [vmem:[#allocation5 + $0x148] sm:$0xff]  ;;  %v86_v45 = vld [vmem:[#allocation5 + $0x150] sm:$0xff]  ;;  %v51_v46 = vld [vmem:[#allocation5 + $0x38] sm:$0xff] }
  0x1b   :  { %175 = vmatpush.msra.mxu3 %v93_v27  ;;  %115 = vmatpush.msra.mxu0 %v60_v32  ;;  %v83_v47 = vld [vmem:[#allocation5 + $0x138] sm:$0xff]  ;;  %v52_v48 = vld [vmem:[#allocation5 + $0x40] sm:$0xff]  ;;  %v49_v50 = vld [vmem:[#allocation5 + $0x28] sm:$0xff] }
  0x1c   :  { %156 = vmatpush.msra.mxu2 %v59_v30  ;;  %135 = vmatpush.msra.mxu1 %v92_v33  ;;  %v84_v49 = vld [vmem:[#allocation5 + $0x140] sm:$0xff]  ;;  %v81_v51 = vld [vmem:[#allocation5 + $0x128] sm:$0xff]  ;;  %v50_v52 = vld [vmem:[#allocation5 + $0x30] sm:$0xff] }
  0x1d   :  { %176 = vmatpush.msra.mxu3 %v91_v31  ;;  %116 = vmatpush.msra.mxu0 %v58_v36  ;;  %v82_v53 = vld [vmem:[#allocation5 + $0x130] sm:$0xff]  ;;  %v47_v54 = vld [vmem:[#allocation5 + $0x18] sm:$0xff]  ;;  %v48_v56 = vld [vmem:[#allocation5 + $0x20] sm:$0xff] }
  0x1e   :  { %157 = vmatpush.msra.mxu2 %v57_v34  ;;  %136 = vmatpush.msra.mxu1 %v90_v37  ;;  %v79_v55 = vld [vmem:[#allocation5 + $0x118] sm:$0xff]  ;;  %v80_v57 = vld [vmem:[#allocation5 + $0x120] sm:$0xff]  ;;  %v45_v58 = vld [vmem:[#allocation5 + $0x8] sm:$0xff] }
  0x1f   :  { %177 = vmatpush.msra.mxu3 %v89_v35  ;;  %117 = vmatpush.msra.mxu0 %v56_v40  ;;  %v77_v59 = vld [vmem:[#allocation5 + $0x108] sm:$0xff]  ;;  %v42_v60 = vld [vmem:[#allocation2] sm:$0xff]  ;;  %v43_v61 = vld [vmem:[#allocation2 + $0x8] sm:$0xff] }
  0x20   :  { %158 = vmatpush.msra.mxu2 %v55_v38  ;;  %137 = vmatpush.msra.mxu1 %v88_v41  ;;  %v46_v62 = vld [vmem:[#allocation5 + $0x10] sm:$0xff]  ;;  %v44_v0 = vld [vmem:[#allocation5] sm:$0xff] }
  0x21   :  { %178 = vmatpush.msra.mxu3 %v87_v39  ;;  %118 = vmatpush.msra.mxu0 %v54_v44  ;;  %v78_v63 = vld [vmem:[#allocation5 + $0x110] sm:$0xff]  ;;  %v76_v1 = vld [vmem:[#allocation5 + $0x100] sm:$0xff] }
  0x22   :  { %159 = vmatpush.msra.mxu2 %v53_v42  ;;  %138 = vmatpush.msra.mxu1 %v86_v45 }
  0x23   :  { %179 = vmatpush.msra.mxu3 %v85_v43  ;;  %119 = vmatpush.msra.mxu0 %v52_v48 }
  0x24   :  { %160 = vmatpush.msra.mxu2 %v51_v46  ;;  %139 = vmatpush.msra.mxu1 %v84_v49 }
  0x25   :  { %180 = vmatpush.msra.mxu3 %v83_v47  ;;  %120 = vmatpush.msra.mxu0 %v50_v52 }
  0x26   :  { %161 = vmatpush.msra.mxu2 %v49_v50  ;;  %140 = vmatpush.msra.mxu1 %v82_v53 }
  0x27   :  { %181 = vmatpush.msra.mxu3 %v81_v51  ;;  %121 = vmatpush.msra.mxu0 %v48_v56 }
  0x28   :  { %162 = vmatpush.msra.mxu2 %v47_v54  ;;  %141 = vmatpush.msra.mxu1 %v80_v57 }
  0x29   :  { %182 = vmatpush.msra.mxu3 %v79_v55  ;;  %122 = vmatpush.msra.mxu0 %v46_v62 }
  0x2a   :  { %163 = vmatpush.msra.mxu2 %v45_v58  ;;  %142 = vmatpush.msra.mxu1 %v78_v63 }
  0x2b   :  { %183 = vmatpush.msra.mxu3 %v77_v59  ;;  %164 = vmatmul.f32.vlgmr.msra.gmra.mxu2 %v42_v60 }
  0x2c   :  { %184 = vmatmul.f32.vlgmr.msra.gmra.mxu3 %v43_v61  ;;  %123 = vmatpush.msra.mxu0 %v44_v0 }
  0x2d   :  { %143 = vmatpush.msra.mxu1 %v76_v1  ;;  %124 = vmatmul.f32.vlgmr.msra.gmra.mxu0 %v42_v60 }
  0x2e   :  { %144 = vmatmul.f32.vlgmr.msra.gmra.mxu1 %v43_v61 }
  0xaa   :  { %v125_v2 = vpop.f32.mrf.mxu0 }
  0xab   :  { %v145_v3 = vpop.f32.mrf.mxu1 }
  0xac   :  { %v146_v4 = vadd.f32 %v145_v3, %v125_v2 }
  0xae   :  { %v165_v5 = vpop.f32.mrf.mxu2  ;;  %v188_v7 = vmul.f32 0.028571429, %v146_v4 }
  0xaf   :  { %v185_v6 = vpop.f32.mrf.mxu3 }
  0xb0   :  { %v186_v8 = vadd.f32 %v185_v6, %v165_v5  ;;  %190 = vst [vmem:[#allocation7] sm:$0xff] %v188_v7 }
  0xb2   :  { %v189_v9 = vmul.f32 0.028571429, %v186_v8 }
  0xb4   :  { %191 = vst [vmem:[#allocation7 + $0x8] sm:$0xff] %v189_v9 }
  0xb5   :  { %202 = dma.vmem_to_hbm [thread:$0]  %s198_s1, 256, %s200_s23, [#allocation4]  }
  0xb6   :  { %291 = dma.done.wait [#allocation4], 256  }
  0xb7   :  { %292 = vsyncadd [#allocation4], 4294967040 }
  0xb8   :  { %207 = vsyncpa [#allocation3], 1 }
  0xb9   :  { %208 = vsyncpa [#allocation6], 1 }
  0xba   :  { %209 = vsyncpa [#allocation4], 1 }

</bundles_post_ra>
